<compile_context>
chip_gen: v7x
topology: tpu7x:2x2x1
jax: 0.10.0
libtpu: 0.0.40
codegen_flags: <defaults>
</compile_context>

<pallas_src>
import jax
import jax.numpy as jnp
from jax.experimental import pallas as pl
from jax.experimental.pallas import tpu as pltpu

K_IN = 784        # 28*28 flattened input features (no HBM-side K padding)
N_PAD = 128       # 10 logits padded up to one full lane tile
NEG_BIG = -1e30   # finite "-inf" for padded logit columns


def fused_kernel(x_ref, w_ref, b_ref, o_ref):
    # x_ref: (TILE_B, 784) f32 | w_ref: (784, N_PAD) bf16 | b_ref: (1, N_PAD) f32
    # Cast x to bf16 in-kernel (cheap VPU pass hidden under the DMA), one MXU
    # pass with f32 accumulation.
    x_bf = x_ref[...].astype(jnp.bfloat16)
    logits = jnp.dot(x_bf, w_ref[...],
                     preferred_element_type=jnp.float32) + b_ref[...]
    # Numerically stable log_softmax, kept in f32 so the -1e30 padded columns
    # underflow cleanly (exp -> 0) and never affect the normalization.
    m = jnp.max(logits, axis=-1, keepdims=True)
    shifted = logits - m
    lse = jnp.log(jnp.sum(jnp.exp(shifted), axis=-1, keepdims=True))
    o_ref[...] = shifted - lse


def _round_up(v, m):
    return -(-v // m) * m


def conv2d_then_linear_20(x, conv_w, conv_b, lin_w, *, tile_b=2048):
    """x: (B, 1, 28, 28) f32; conv_w: (19, 1, 28, 28); conv_b: (19,); lin_w: (10, 19)."""
    B = x.shape[0]
    x_flat = x.reshape(B, K_IN)  # f32, fed directly -- no pad / cast pre-pass

    # Fold conv-matmul and linear into one weight / bias (f32 in the wrapper).
    w0 = conv_w.reshape(19, K_IN).T.astype(jnp.float32)       # (784, 19)
    w1 = lin_w.T.astype(jnp.float32)                          # (19, 10)
    w_comb = w0 @ w1                                          # (784, 10)
    b_comb = conv_b.astype(jnp.float32) @ w1                  # (10,)

    # Pad only the N (logit) dimension: zero weights + -1e30 bias in pad cols.
    w_pad = (jnp.zeros((K_IN, N_PAD), jnp.float32)
             .at[:, :10].set(w_comb).astype(jnp.bfloat16))
    b_pad = jnp.full((1, N_PAD), NEG_BIG, jnp.float32).at[0, :10].set(b_comb)

    # Tile selection: no batch rounding.  For mid-size batches aim for >=2
    # grid steps (keeps both v7x TensorCores busy); tiny batches get a single
    # full-extent block (block dim == array dim satisfies the (8,128) rule).
    if B <= tile_b:
        if B >= 16:
            tile_b_eff = _round_up(-(-B // 2), 8)   # ceil(B/2) rounded up to 8
        else:
            tile_b_eff = B
    else:
        tile_b_eff = _round_up(tile_b, 8)
    grid = (pl.cdiv(B, tile_b_eff),)

    cost = pl.CostEstimate(
        flops=2 * B * K_IN * N_PAD,                 # padded MXU work
        transcendentals=B * N_PAD,                  # exp over padded lanes
        bytes_accessed=(B * K_IN * 4                # x (f32, read once)
                        + K_IN * N_PAD * 2          # weight (bf16, resident)
                        + N_PAD * 4                 # bias (f32)
                        + B * N_PAD * 4),           # output (f32)
    )

    out = pl.pallas_call(
        fused_kernel,
        out_shape=jax.ShapeDtypeStruct((B, N_PAD), jnp.float32),
        grid=grid,
        in_specs=[
            pl.BlockSpec((tile_b_eff, K_IN), lambda i: (i, 0)),  # x tile, pipelined
            pl.BlockSpec((K_IN, N_PAD), lambda i: (0, 0)),       # weight, resident
            pl.BlockSpec((1, N_PAD), lambda i: (0, 0)),          # bias, resident
        ],
        out_specs=pl.BlockSpec((tile_b_eff, N_PAD), lambda i: (i, 0)),
        compiler_params=pltpu.CompilerParams(
            dimension_semantics=("parallel",),
            vmem_limit_bytes=40 * 1024 * 1024,
        ),
        cost_estimate=cost,
    )(x_flat, w_pad, b_pad)

    # Rows are already exact (no batch padding); only drop the padded columns.
    return out[:, :10]


def init_params(key):
    """Deterministic parameter init mimicking the PyTorch module's shapes."""
    k0, k1, k2 = jax.random.split(key, 3)
    fan_in_conv = 1 * 28 * 28
    bound0 = 1.0 / jnp.sqrt(fan_in_conv)
    conv_w = jax.random.uniform(k0, (19, 1, 28, 28), jnp.float32, -bound0, bound0)
    conv_b = jax.random.uniform(k1, (19,), jnp.float32, -bound0, bound0)
    fan_in_lin = 19
    bound1 = 1.0 / jnp.sqrt(fan_in_lin)
    lin_w = jax.random.uniform(k2, (10, 19), jnp.float32, -bound1, bound1)
    return conv_w, conv_b, lin_w


if __name__ == "__main__":
    key = jax.random.PRNGKey(0)
    kx, kp = jax.random.split(key)

    B = 2
    x = jax.random.normal(kx, (B, 1, 28, 28), jnp.float32)
    conv_w, conv_b, lin_w = init_params(kp)

    out = conv2d_then_linear_20(x, conv_w, conv_b, lin_w)
    out = jax.block_until_ready(out)

    # Full-precision reference (original module semantics) — bf16 tolerance.
    x_flat = x.reshape(B, 784)
    w_comb = conv_w.reshape(19, 784).T @ lin_w.T
    b_comb = conv_b @ lin_w.T
    ref_f32 = jax.nn.log_softmax(x_flat @ w_comb + b_comb, axis=1)
    assert jnp.allclose(out, ref_f32, atol=5e-2, rtol=5e-2), (out, ref_f32)

    # Same-precision reference (bf16 operands, f32 accumulate) — tight check
    # that the kernel math itself is exact up to accumulation order.
    xb = x_flat.astype(jnp.bfloat16).astype(jnp.float32)
    wb = w_comb.astype(jnp.bfloat16).astype(jnp.float32)
    ref_bf = jax.nn.log_softmax(xb @ wb + b_comb, axis=1)
    assert jnp.allclose(out, ref_bf, atol=1e-4, rtol=1e-4), (out, ref_bf)

    print("KERNEL_OK")
</pallas_src>

<mosaic_0001>
module attributes {stable_mosaic.version = 11 : i64} {
  func.func @fused_kernel(%arg0: i32, %arg1: memref<2x784xf32, #tpu.memory_space<vmem>>, %arg2: memref<784x128xbf16, #tpu.memory_space<vmem>>, %arg3: memref<1x128xf32, #tpu.memory_space<vmem>>, %arg4: memref<2x128xf32, #tpu.memory_space<vmem>>) attributes {dimension_semantics = [#tpu.dimension_semantics<parallel>], iteration_bounds = array<i64: 1>, scalar_prefetch = 0 : i64, scratch_operands = 0 : i64, tpu.core_type = #tpu.core_type<tc>, window_params = [{transform_indices = @transform_0, window_bounds = array<i64: 2, 784>}, {pipeline_mode = #tpu.pipeline_mode<synchronous>, transform_indices = @transform_1, window_bounds = array<i64: 784, 128>}, {pipeline_mode = #tpu.pipeline_mode<synchronous>, transform_indices = @transform_2, window_bounds = array<i64: 1, 128>}, {transform_indices = @transform_3, window_bounds = array<i64: 2, 128>}]} {
    %c0 = arith.constant 0 : index
    %c0_0 = arith.constant 0 : index
    %0 = vector.load %arg1[%c0, %c0_0] : memref<2x784xf32, #tpu.memory_space<vmem>>, vector<2x784xf32>
    %1 = arith.truncf %0 : vector<2x784xf32> to vector<2x784xbf16>
    %c0_1 = arith.constant 0 : index
    %c0_2 = arith.constant 0 : index
    %2 = vector.load %arg2[%c0_1, %c0_2] : memref<784x128xbf16, #tpu.memory_space<vmem>>, vector<784x128xbf16>
    %cst = arith.constant dense<0.000000e+00> : vector<2x128xf32>
    %3 = tpu.matmul %1, %2, %cst {dimension_numbers = #tpu.dot_dimension_numbers<[1], [0], [0], [1], [0, 0, 1, 1], [], []>} : vector<2x784xbf16>, vector<784x128xbf16>, vector<2x128xf32> -> vector<2x128xf32>
    %c0_3 = arith.constant 0 : index
    %c0_4 = arith.constant 0 : index
    %4 = vector.load %arg3[%c0_3, %c0_4] : memref<1x128xf32, #tpu.memory_space<vmem>>, vector<1x128xf32>
    %5 = vector.broadcast %4 : vector<1x128xf32> to vector<2x128xf32>
    %6 = arith.addf %3, %5 : vector<2x128xf32>
    %cst_5 = arith.constant dense<0xFF800000> : vector<2xf32>
    %7 = vector.multi_reduction <maximumf>, %6, %cst_5 [1] : vector<2x128xf32> to vector<2xf32>
    %8 = vector.shape_cast %7 : vector<2xf32> to vector<2x1xf32>
    %9 = vector.broadcast %8 : vector<2x1xf32> to vector<2x128xf32>
    %10 = arith.subf %6, %9 : vector<2x128xf32>
    %11 = math.exp %10 : vector<2x128xf32>
    %cst_6 = arith.constant dense<0.000000e+00> : vector<2xf32>
    %12 = vector.multi_reduction <add>, %11, %cst_6 [1] : vector<2x128xf32> to vector<2xf32>
    %13 = vector.shape_cast %12 : vector<2xf32> to vector<2x1xf32>
    %14 = math.log %13 : vector<2x1xf32>
    %15 = vector.broadcast %14 : vector<2x1xf32> to vector<2x128xf32>
    %16 = arith.subf %10, %15 : vector<2x128xf32>
    %c0_7 = arith.constant 0 : index
    %c0_8 = arith.constant 0 : index
    %17 = vector.load %arg4[%c0_7, %c0_8] : memref<2x128xf32, #tpu.memory_space<vmem>>, vector<2x128xf32>
    tpu.vector_store %arg4[%c0_7, %c0_8], %16 {strides = array<i32>} : memref<2x128xf32, #tpu.memory_space<vmem>>, vector<2x128xf32>,
    return
  }
  func.func @transform_0(%arg0: i32) -> (i32, i32) {
    %c0_i32 = arith.constant 0 : i32
    %c0_i32_0 = arith.constant 0 : i32
    return %arg0, %c0_i32 : i32, i32
  }
  func.func @transform_1(%arg0: i32) -> (i32, i32) {
    %c0_i32 = arith.constant 0 : i32
    %c0_i32_0 = arith.constant 0 : i32
    %c0_i32_1 = arith.constant 0 : i32
    return %c0_i32, %c0_i32_0 : i32, i32
  }
  func.func @transform_2(%arg0: i32) -> (i32, i32) {
    %c0_i32 = arith.constant 0 : i32
    %c0_i32_0 = arith.constant 0 : i32
    %c0_i32_1 = arith.constant 0 : i32
    return %c0_i32, %c0_i32_0 : i32, i32
  }
  func.func @transform_3(%arg0: i32) -> (i32, i32) {
    %c0_i32 = arith.constant 0 : i32
    %c0_i32_0 = arith.constant 0 : i32
    return %arg0, %c0_i32 : i32, i32
  }
}

</mosaic_0001>

<bundles_post_ra>
// kernel: tpu_custom_call.1
= control target key start
LH: loop header
LB: loop body
LE: loop exit
PB: predicated region body
PF: predicated region fallthrough
CT: control target
= control target key end

     0   :  { %8 = vsyncpa [#allocation3], 0  ;;  %s1020_s0 = inlined_call_operand.hbm [shape: f32[2,784], index: 0, kind: input, shape index: {}]   ;;  %s1021_s1 = inlined_call_operand.hbm [shape: bf16[784,128], index: 1, kind: input, shape index: {}]   ;;  %s1022_s2 = inlined_call_operand.vmem [shape: f32[1,128], index: 2, kind: input, shape index: {}]   ;;  %s1023_s3 = inlined_call_operand.hbm [shape: f32[2,128], index: 3, kind: output, shape index: {}]  }
   0x1   :  { %9 = vsyncpa [#allocation6], 0 }
   0x2   :  { %10 = vsyncpa [#allocation4], 0  ;;  %s946_s12 = smov [#allocation2]   ;;  %s947_s14 = smov [#allocation5]  }
   0x3   :  { %s17_s13 = sshll.u32 %s946_s12, 4  ;;  %s26_s15 = sshll.u32 %s947_s14, 4  ;;  %s18_s13 = int_to_ptr.vmem [resolvable:$true] %s17_s13  ;;  %s974_s15 = int_to_ptr.vmem [resolvable:$true] %s26_s15 }
   0x4   :  { %s874_s18 = scalar_lea.hbm %s1020_s0, 224 }
   0x5   :  { %p875_p0 = scmp.ne.s32.totalorder %s1020_s0, %s874_s18  ;;  %p878_p1 = scmp.lt.u32.totalorder %s874_s18, %s1020_s0 }
   0x7   :  { %p880_p2 = pnand %p878_p1, %p875_p0 }
   0x9   :  { %883 = shalt.err (!%p880_p2)
}
   0xa   :  { %s884_s23 = scalar_lea.vmem %s18_s13, 224  ;;  %p889_p4 = scmp.lt.s32.totalorder %s18_s13, %s18_s13 }
   0xb   :  { %p885_p3 = scmp.ne.s32.totalorder %s18_s13, %s884_s23  ;;  %p890_p5 = scmp.lt.s32.totalorder %s884_s23, %s884_s23 }
   0xd   :  { %p891_p6 = por %p890_p5, %p889_p4 }
   0xf   :  { %p892_p7 = pnand %p891_p6, %p885_p3 }
  0x11   :  { %895 = shalt.err (!%p892_p7)
}
  0x12   :  { %20 = dma.hbm_to_vmem [thread:$0]  %s1020_s0, 224, %s18_s13, [#allocation3]  }
  0x13   :  { %s896_s28 = scalar_lea.hbm %s1021_s1, 6272 }
  0x14   :  { %p897_p8 = scmp.ne.s32.totalorder %s1021_s1, %s896_s28  ;;  %p900_p9 = scmp.lt.u32.totalorder %s896_s28, %s1021_s1 }
  0x16   :  { %p902_p10 = pnand %p900_p9, %p897_p8 }
  0x18   :  { %905 = shalt.err (!%p902_p10)
}
  0x19   :  { %s906_s6 = scalar_lea.vmem %s974_s15, 6272  ;;  %p911_p12 = scmp.lt.s32.totalorder %s974_s15, %s974_s15 }
  0x1a   :  { %p907_p11 = scmp.ne.s32.totalorder %s974_s15, %s906_s6  ;;  %p912_p13 = scmp.lt.s32.totalorder %s906_s6, %s906_s6 }
  0x1c   :  { %p913_p0 = por %p912_p13, %p911_p12 }
  0x1e   :  { %p914_p1 = pnand %p913_p0, %p907_p11 }
  0x20   :  { %917 = shalt.err (!%p914_p1)
}
  0x21   :  { %s948_s0 = smov 64   ;;  %s949_s7 = smov 4  }
  0x22   :  { %32 = dma.hbm_to_vmem [thread:$0]  %s1021_s1, 6272, %s974_s15, [#allocation6], %s948_s0, %s948_s0, %s949_s7  }
  0x23   :  { %940 = dma.done.wait [#allocation3], 224  }
  0x24   :  { %941 = vsyncadd [#allocation3], 4294967072 }
  0x25   :  { %942 = dma.done.wait [#allocation6], 6272  }
  0x26   :  { %943 = vsyncadd [#allocation6], 4294961024  ;;  %v819_v0 = vld [vmem:[#allocation5 + $0x40] sm:$0xff]   ;;  %v823_v4 = vld [vmem:[#allocation5 + $0x48] sm:$0xff]   ;;  %v950_v21 = vmov 1983009808   ;;  %v50_v23 = vlaneseq }
  0x27   :  { %v820_v1 = vld [vmem:[#allocation5] sm:$0xff]   ;;  %737 = vmatprep.subr.bf16.mxu0 %v819_v0  ;;  %v824_v5 = vld [vmem:[#allocation5 + $0x8] sm:$0xff]   ;;  %v827_v8 = vld [vmem:[#allocation5 + $0x50] sm:$0xff]   ;;  %v48_v22 = vunpack.c.l.s4 %v950_v21  ;;  %v951_v45 = vmov 0.0   ;;  %vm952_vm0 = vmmov 0   ;;  %vm492_vm1 = vcmask 130048  }
  0x28   :  { %v821_v2 = vld [vmem:[#allocation5 + $0xc0] sm:$0xff]   ;;  %738 = vmatpush3.bf16.msra.mxu0 %v820_v1  ;;  %v825_v6 = vld [vmem:[#allocation5 + $0xc8] sm:$0xff]   ;;  %v828_v9 = vld [vmem:[#allocation5 + $0x10] sm:$0xff]   ;;  %v51_v29 = vshrl.u32 %v50_v23, 7  ;;  %vm656_vm2 = vcmask 1041408  }
  0x29   :  { %v822_v3 = vld [vmem:[#allocation5 + $0x80] sm:$0xff]   ;;  %759 = vmatprep.subr.bf16.mxu1 %v821_v2  ;;  %739 = vmatprep.subr.bf16.mxu0 %v823_v4  ;;  %v826_v7 = vld [vmem:[#allocation5 + $0x88] sm:$0xff]   ;;  %v829_v10 = vld [vmem:[#allocation5 + $0xd0] sm:$0xff]   ;;  %v49_v28 = vunpack.c.0.s8 %v48_v22 }
  0x2a   :  { %760 = vmatpush3.bf16.msra.mxu1 %v822_v3  ;;  %v830_v11 = vld [vmem:[#allocation5 + $0x90] sm:$0xff]   ;;  %v831_v12 = vld [vmem:[#allocation5 + $0x58] sm:$0xff]   ;;  %v835_v16 = vld [vmem:[#allocation5 + $0x60] sm:$0xff]  }
  0x2b   :  { %761 = vmatprep.subr.bf16.mxu1 %v825_v6  ;;  %v832_v13 = vld [vmem:[#allocation5 + $0x18] sm:$0xff]   ;;  %v836_v17 = vld [vmem:[#allocation5 + $0x20] sm:$0xff]   ;;  %v839_v20 = vld [vmem:[#allocation5 + $0x68] sm:$0xff]   ;;  %v52_v34 = vsub.s32 %v49_v28, %v51_v29 }
  0x2c   :  { %740 = vmatpush3.bf16.msra.mxu0 %v824_v5  ;;  %v833_v14 = vld [vmem:[#allocation5 + $0xd8] sm:$0xff]   ;;  %v837_v18 = vld [vmem:[#allocation5 + $0xe0] sm:$0xff]   ;;  %v840_v24 = vld [vmem:[#allocation5 + $0x28] sm:$0xff]  }
  0x2d   :  { %741 = vmatprep.subr.bf16.mxu0 %v827_v8  ;;  %v834_v15 = vld [vmem:[#allocation5 + $0x98] sm:$0xff]   ;;  %v838_v19 = vld [vmem:[#allocation5 + $0xa0] sm:$0xff]   ;;  %v841_v25 = vld [vmem:[#allocation5 + $0xe8] sm:$0xff]  }
  0x2e   :  { %762 = vmatpush3.bf16.msra.mxu1 %v826_v7  ;;  %v842_v26 = vld [vmem:[#allocation5 + $0xa8] sm:$0xff]   ;;  %v843_v27 = vld [vmem:[#allocation5 + $0x70] sm:$0xff]   ;;  %v847_v33 = vld [vmem:[#allocation5 + $0x78] sm:$0xff]  }
  0x2f   :  { %763 = vmatprep.subr.bf16.mxu1 %v829_v10  ;;  %v844_v30 = vld [vmem:[#allocation5 + $0x30] sm:$0xff]   ;;  %v848_v35 = vld [vmem:[#allocation5 + $0x38] sm:$0xff]   ;;  %v851_v41 = vld [vmem:[#allocation5 + $0x140] sm:$0xff]  }
  0x30   :  { %742 = vmatpush3.bf16.msra.mxu0 %v828_v9  ;;  %v845_v31 = vld [vmem:[#allocation5 + $0xf0] sm:$0xff]   ;;  %v849_v36 = vld [vmem:[#allocation5 + $0xf8] sm:$0xff]   ;;  %v853_v48 = vld [vmem:[#allocation5 + $0x100] sm:$0xff]  }
  0x31   :  { %743 = vmatprep.subr.bf16.mxu0 %v831_v12  ;;  %v846_v32 = vld [vmem:[#allocation5 + $0xb0] sm:$0xff]   ;;  %v850_v39 = vld [vmem:[#allocation5 + $0xb8] sm:$0xff]   ;;  %v854_v50 = vld [vmem:[#allocation5 + $0x148] sm:$0xff]  }
  0x32   :  { %764 = vmatpush3.bf16.msra.mxu1 %v830_v11  ;;  %v42_v37 = vld [vmem:[#allocation2] sm:$0xff]  ;;  %v855_v52 = vld [vmem:[#allocation5 + $0x108] sm:$0xff]   ;;  %v860_v57 = vld [vmem:[#allocation5 + $0x160] sm:$0xff]  }
  0x33   :  { %765 = vmatprep.subr.bf16.mxu1 %v833_v14  ;;  %v53_v38 = vrot.slane %v42_v37, %v52_v34  ;;  %v46_v40 = vcombine.high %v42_v37, %v42_v37  ;;  %v856_v53 = vld [vmem:[#allocation5 + $0x150] sm:$0xff]   ;;  %v858_v55 = vld [vmem:[#allocation5 + $0x158] sm:$0xff]   ;;  %v868_v58 = vld [vmem:[#allocation5 + $0x180] sm:$0xff]  }
  0x34   :  { %744 = vmatpush3.bf16.msra.mxu0 %v832_v13  ;;  %v857_v54 = vld [vmem:[#allocation5 + $0x110] sm:$0xff]   ;;  %v859_v56 = vld [vmem:[#allocation5 + $0x118] sm:$0xff]   ;;  %v861_v62 = vld [vmem:[#allocation5 + $0x120] sm:$0xff]  }
  0x35   :  { %745 = vmatprep.subr.bf16.mxu0 %v835_v16  ;;  %v61_v42 = vcombine.high %v53_v38, %v53_v38  ;;  %v60_v43 = vrot.slane %v46_v40, %v52_v34  ;;  %v86_v44 = vpack.c.bf16 %v53_v38, %v53_v38  ;;  %v43_v59 = vld [vmem:[#allocation2 + $0x8] sm:$0x3f]  ;;  %v862_v1 = vld [vmem:[#allocation5 + $0x168] sm:$0xff]   ;;  %v864_v5 = vld [vmem:[#allocation5 + $0x170] sm:$0xff]  }
  0x36   :  { %766 = vmatpush3.bf16.msra.mxu1 %v834_v15  ;;  %v63_v60 = vcombine.high %v43_v59, %v43_v59  ;;  %v70_v61 = vrot.slane %v43_v59, %v52_v34  ;;  %v863_v4 = vld [vmem:[#allocation5 + $0x128] sm:$0xff]   ;;  %v865_v6 = vld [vmem:[#allocation5 + $0x130] sm:$0xff]   ;;  %v866_v7 = vld [vmem:[#allocation5 + $0x178] sm:$0xff]  }
  0x37   :  { %767 = vmatprep.subr.bf16.mxu1 %v837_v18  ;;  %v87_v46 = vpack.c.bf16 %v61_v42, %v61_v42  ;;  %v62_v47 = vcombine.high %v60_v43, %v60_v43  ;;  %v88_v49 = vpack.c.bf16 %v60_v43, %v60_v43  ;;  %v867_v8 = vld [vmem:[#allocation5 + $0x138] sm:$0xff]   ;;  %v686_v11 = vld [vmem:[%s1022_s2] ss:$0 sm:$0xff]  ;;  %s953_s2 = smov [#allocation7]  }
  0x38   :  { %746 = vmatpush3.bf16.msra.mxu0 %v836_v17  ;;  %v77_v63 = vrot.slane %v63_v60, %v52_v34  ;;  %v78_v0 = vcombine.high %v70_v61, %v70_v61  ;;  %v90_v9 = vpack.c.bf16 %v70_v61, %v70_v61  ;;  %s676_s11 = sshll.u32 %s953_s2, 4  ;;  %s677_s11 = int_to_ptr.vmem [resolvable:$true] %s676_s11 }
  0x39   :  { %747 = vmatprep.subr.bf16.mxu0 %v839_v20  ;;  %528 = vmatprep.mubr.bf16.mxu0 %v87_v46  ;;  %v89_v51 = vpack.c.bf16 %v62_v47, %v62_v47  ;;  %s918_s12 = scalar_lea.vmem %s677_s11, 32  ;;  %p923_p3 = scmp.lt.s32.totalorder %s677_s11, %s677_s11 }
  0x3a   :  { %768 = vmatpush3.bf16.msra.mxu1 %v838_v19  ;;  %v91_v2 = vpack.c.bf16 %v78_v0, %v78_v0  ;;  %v92_v3 = vpack.c.bf16 %v77_v63, %v77_v63  ;;  %p919_p2 = scmp.ne.s32.totalorder %s677_s11, %s918_s12  ;;  %p924_p4 = scmp.lt.s32.totalorder %s918_s12, %s918_s12 }
  0x3b   :  { %769 = vmatprep.subr.bf16.mxu1 %v841_v25  ;;  %568 = vmatprep.mubr.bf16.mxu1 %v89_v51 }
  0x3c   :  { %748 = vmatpush3.bf16.msra.mxu0 %v840_v24  ;;  %p925_p5 = por %p924_p4, %p923_p3 }
  0x3d   :  { %749 = vmatprep.subr.bf16.mxu0 %v843_v27 }
  0x3e   :  { %770 = vmatpush3.bf16.msra.mxu1 %v842_v26  ;;  %p926_p6 = pnand %p925_p5, %p919_p2 }
  0x3f   :  { %771 = vmatprep.subr.bf16.mxu1 %v845_v31 }
  0x40   :  { %750 = vmatpush3.bf16.msra.mxu0 %v844_v30 }
  0x41   :  { %751 = vmatprep.subr.bf16.mxu0 %v847_v33 }
  0x42   :  { %772 = vmatpush3.bf16.msra.mxu1 %v846_v32 }
  0x43   :  { %773 = vmatprep.subr.bf16.mxu1 %v849_v36 }
  0x44   :  { %752 = vmatpush3.bf16.msra.mxu0 %v848_v35 }
  0x45   :  { %781 = vmatprep.subr.bf16.mxu0 %v851_v41 }
  0x46   :  { %774 = vmatpush3.bf16.msra.mxu1 %v850_v39 }
  0x47   :  { %805 = vmatprep.subr.bf16.mxu1 %v951_v45  ;;  %529 = vmatmul.mubr.bf16.vlgmr.msra.gmra.mrb[0].mxu0 %v86_v44 }
  0x48   :  { %782 = vmatpush3.bf16.msra.mxu0 %v853_v48  ;;  %608 = vmatprep.mubr.bf16.mxu0 %v91_v2 }
  0x49   :  { %569 = vmatmul.mubr.bf16.vlgmr.msra.gmra.mrb[0].mxu1 %v88_v49  ;;  %783 = vmatprep.subr.bf16.mxu0 %v854_v50 }
  0x4a   :  { %807 = vmatprep.mubr.msk.bf16.mxu1 %vm952_vm0, %v951_v45  ;;  %806 = vmatpush3.bf16.msra.mxu1 %v868_v58 }
  0x4c   :  { %784 = vmatpush3.bf16.msra.mxu0 %v855_v52 }
  0x4d   :  { %785 = vmatprep.subr.bf16.mxu0 %v856_v53 }
  0x50   :  { %786 = vmatpush3.bf16.msra.mxu0 %v857_v54 }
  0x51   :  { %787 = vmatprep.subr.bf16.mxu0 %v858_v55  ;;  %808 = vmatmul.mubr.msk.bf16.vlgmr.msra.gmra.mrb[4].mxu1 %vm492_vm1, %v92_v3 }
  0x54   :  { %788 = vmatpush3.bf16.msra.mxu0 %v859_v56 }
  0x55   :  { %789 = vmatprep.subr.bf16.mxu0 %v860_v57 }
  0x58   :  { %790 = vmatpush3.bf16.msra.mxu0 %v861_v62 }
  0x59   :  { %791 = vmatprep.subr.bf16.mxu0 %v862_v1 }
  0x5c   :  { %792 = vmatpush3.bf16.msra.mxu0 %v863_v4 }
  0x5d   :  { %793 = vmatprep.subr.bf16.mxu0 %v864_v5 }
  0x60   :  { %794 = vmatpush3.bf16.msra.mxu0 %v865_v6 }
  0x61   :  { %795 = vmatprep.subr.bf16.mxu0 %v866_v7 }
  0x64   :  { %796 = vmatpush3.bf16.msra.mxu0 %v867_v8 }
  0x67   :  { %609 = vmatmul.mubr.bf16.vlgmr.msra.gmra.mrb[4].mxu0 %v90_v9 }
 0x11a   :  { %v753_v10 = vpop.f32.mrb[0].mxu0 }
 0x11b   :  { %v754_v12 = vpop.f32.mrb[1].mxu0 }
 0x11c   :  { %v755_v13 = vadd.f32 %v754_v12, %v753_v10  ;;  %v756_v14 = vpop.f32.mrb[2].mxu0  ;;  %v775_v15 = vpop.f32.mrb[0].mxu1 }
 0x11d   :  { %v757_v16 = vpop.f32.mrb[3].mxu0  ;;  %v776_v17 = vpop.f32.mrb[1].mxu1 }
 0x11e   :  { %v531_v18 = vadd.f32 %v755_v13, %v686_v11  ;;  %v777_v19 = vadd.f32 %v776_v17, %v775_v15  ;;  %v778_v20 = vpop.f32.mrb[2].mxu1 }
 0x11f   :  { %v779_v21 = vpop.f32.mrb[3].mxu1 }
 0x120   :  { %v571_v22 = vadd.f32 %v777_v19, %v531_v18 }
 0x124   :  { %v650_v23 = vpop.f32.mrb[4].mxu1 }
 0x125   :  { %v809_v24 = vpop.f32.mrb[5].mxu1 }
 0x126   :  { %v653_v25 = vpop.f32.mrb[6].mxu1 }
 0x127   :  { %v810_v26 = vpop.f32.mrb[7].mxu1 }
 0x13a   :  { %v797_v27 = vpop.f32.mrb[4].mxu0 }
 0x13b   :  { %v798_v28 = vpop.f32.mrb[5].mxu0 }
 0x13c   :  { %v799_v29 = vadd.f32 %v798_v28, %v797_v27  ;;  %v800_v30 = vpop.f32.mrb[6].mxu0 }
 0x13d   :  { %v801_v31 = vpop.f32.mrb[7].mxu0 }
 0x13e   :  { %v611_v32 = vadd.f32 %v799_v29, %v571_v22 }
 0x140   :  { %v651_v33 = vadd.f32 %v650_v23, %v611_v32 }
 0x142   :  { %v657_v34 = vsel %vm656_vm2, %v651_v33, -inf }
 0x143   :  { %658 = vmax.xlane.f32.xlu0 %v657_v34 }
 0x1d0   :  { %v659_v35 = vpop.xlane.xlu0 %658 }
 0x1d1   :  { %v660_v36 = vsub.f32 %v651_v33, %v659_v35 }
 0x1d3   :  { %v661_v37 = vmul.f32 1.442695, %v660_v36 }
 0x1d5   :  { %870 = vpow2.f32 %v661_v37 }
 0x1df   :  { %v871_v38 = vpop.eup %870 }
 0x1e0   :  { %v663_v39 = vsel %vm656_vm2, %v871_v38, 0.0 }
 0x1e1   :  { %664 = vadd.xlane.f32.xlu0 %v663_v39 }
 0x26e   :  { %v665_v40 = vpop.xlane.xlu0 %664 }
 0x26f   :  { %872 = vlog2.f32 %v665_v40 }
 0x279   :  { %v873_v41 = vpop.eup %872 }
 0x27a   :  { %v667_v42 = vmul.f32 0.6931472, %v873_v41 }
 0x27c   :  { %v668_v43 = vsub.f32 %v660_v36, %v667_v42 }
 0x27e   :  { %669 = vst [vmem:[#allocation7] sm:$0x3] %v668_v43 }
 0x27f   :  { %929 = shalt.err (!%p926_p6)
}
 0x280   :  { %s930_s15 = scalar_lea.hbm %s1023_s3, 32 }
 0x281   :  { %p931_p7 = scmp.ne.s32.totalorder %s1023_s3, %s930_s15  ;;  %p934_p8 = scmp.lt.u32.totalorder %s930_s15, %s1023_s3 }
 0x283   :  { %p936_p9 = pnand %p934_p8, %p931_p7 }
 0x285   :  { %939 = shalt.err (!%p936_p9)
}
 0x286   :  { %679 = dma.vmem_to_hbm [thread:$0]  %s677_s11, 32, %s1023_s3, [#allocation4]  }
 0x287   :  { %944 = dma.done.wait [#allocation4], 32  }
 0x288   :  { %945 = vsyncadd [#allocation4], 4294967264 }
 0x289   :  { %683 = vsyncpa [#allocation3], 1 }
 0x28a   :  { %684 = vsyncpa [#allocation6], 1 }
 0x28b   :  { %685 = vsyncpa [#allocation4], 1 }

</bundles_post_ra>
